<compile_context>
chip_gen: v6e
topology: v6e:2x2x1
jax: 0.10.0
libtpu: 0.0.40
codegen_flags: <defaults>
</compile_context>

<pallas_src>
import functools

import jax
import jax.numpy as jnp
from jax.experimental import pallas as pl
from jax.experimental.pallas import tpu as pltpu


def _vmem_limit_bytes():
    try:
        cap = pltpu.get_tpu_info().vmem_capacity_bytes
    except Exception:
        cap = 64 * 1024 * 1024  # conservative fallback (v7x per-TC VMEM)
    return int(min(cap - 16 * 1024 * 1024, 100 * 1024 * 1024))


_VMEM_LIMIT = _vmem_limit_bytes()


def _adagn_kernel(x_ref, p_ref, scale_ref, shift_ref, o_ref, *, eps):
    """One batch element per grid step.

    x_ref:     (HW, C) activation slab, channels on lanes
    p_ref:     (C, C)  group-averaging matrix: 1/(HW*Cg) within a group, else 0
    scale_ref: (1, C)  z_s * t_s * gamma
    shift_ref: (1, C)  z_s * (t_s * beta + t_b) + z_b
    o_ref:     (HW, C)
    """
    x = x_ref[...]
    # Per-channel first / second moments in f32 (cross-sublane reduce -> XLU).
    s = jnp.sum(x, axis=0, keepdims=True)          # (1, C)
    sq = jnp.sum(x * x, axis=0, keepdims=True)     # (1, C)
    # Per-group mean / E[x^2] broadcast back to channels: one tiny MXU matmul each.
    mean = jnp.dot(s, p_ref[...], preferred_element_type=jnp.float32)   # (1, C)
    ex2 = jnp.dot(sq, p_ref[...], preferred_element_type=jnp.float32)   # (1, C)
    var = jnp.maximum(ex2 - mean * mean, 0.0)      # clamp: no rsqrt of negatives
    inv = jax.lax.rsqrt(var + eps)                 # (1, C), EUP
    # Folded affine epilogue: out = scale * xhat + shift  (1 mul + 1 sub + 1 add / elem)
    o_ref[...] = (x - mean) * (inv * scale_ref[...]) + shift_ref[...]


@functools.partial(jax.jit, static_argnames=("num_groups", "eps"))
def adagn(x, z_s, z_b, t_s=None, t_b=None, gamma=None, beta=None, *,
          num_groups, eps=1e-5):
    """x: (B, C, H, W) NCHW; z_s/z_b/t_s/t_b: (B, C); gamma/beta: (C,).

    Returns (B, C, H, W), matching AdaGN.forward of the PyTorch module
    (nn.GroupNorm affine=True, eps=1e-5 by default).
    """
    B, C, H, W = x.shape
    assert C % num_groups == 0, (C, num_groups)
    HW = H * W
    Cg = C // num_groups

    if gamma is None:
        gamma = jnp.ones((C,), jnp.float32)   # fresh nn.GroupNorm weight
    if beta is None:
        beta = jnp.zeros((C,), jnp.float32)   # fresh nn.GroupNorm bias
    if t_s is None:                           # optional in the reference signature
        t_s = jnp.ones((B, C), jnp.float32)
    if t_b is None:
        t_b = jnp.zeros((B, C), jnp.float32)

    # NCHW -> lane-dense (B, HW, C) slab (layout plumbing in XLA, not in-kernel).
    xr = jnp.transpose(x, (0, 2, 3, 1)).reshape(B, HW, C).astype(jnp.float32)

    # Fold GroupNorm affine + AdaGN modulation into one scale/shift per (B, C):
    #   z_s*(t_s*(gamma*xhat + beta) + t_b) + z_b
    #     = (z_s*t_s*gamma) * xhat + (z_s*(t_s*beta + t_b) + z_b)
    z_s = z_s.astype(jnp.float32)
    z_b = z_b.astype(jnp.float32)
    t_s = t_s.astype(jnp.float32)
    t_b = t_b.astype(jnp.float32)
    gamma = gamma.astype(jnp.float32)
    beta = beta.astype(jnp.float32)
    scale = (z_s * t_s * gamma[None, :]).reshape(B, 1, C)
    shift = (z_s * (t_s * beta[None, :] + t_b) + z_b).reshape(B, 1, C)

    # Group-averaging matrix P: P[i, j] = 1/(HW*Cg) if channels i and j share a group.
    gid = jnp.arange(C, dtype=jnp.int32) // Cg
    pmat = (gid[:, None] == gid[None, :]).astype(jnp.float32) / float(HW * Cg)

    # TODO(synk): for very large H*W the per-batch (HW, C) slab could exceed
    # VMEM; a two-pass (stats grid axis + apply grid axis) tiling over HW would
    # be needed then. Not required at UNet-scale spatial sizes.
    out = pl.pallas_call(
        functools.partial(_adagn_kernel, eps=float(eps)),
        out_shape=jax.ShapeDtypeStruct((B, HW, C), jnp.float32),
        grid_spec=pltpu.PrefetchScalarGridSpec(
            num_scalar_prefetch=0,
            grid=(B,),
            in_specs=[
                pl.BlockSpec((None, HW, C), lambda b: (b, 0, 0)),   # x slab
                pl.BlockSpec((C, C), lambda b: (0, 0)),             # group matrix
                pl.BlockSpec((None, 1, C), lambda b: (b, 0, 0)),    # scale
                pl.BlockSpec((None, 1, C), lambda b: (b, 0, 0)),    # shift
            ],
            out_specs=pl.BlockSpec((None, HW, C), lambda b: (b, 0, 0)),
        ),
        compiler_params=pltpu.CompilerParams(
            dimension_semantics=("parallel",),
            vmem_limit_bytes=_VMEM_LIMIT,
        ),
    )(xr, pmat, scale, shift)

    return jnp.transpose(out.reshape(B, H, W, C), (0, 3, 1, 2))


# ----------------------------------------------------------------------------
# Pure-JAX reference (mirrors PyTorch nn.GroupNorm + AdaGN modulation)
# ----------------------------------------------------------------------------
def adagn_ref(x, z_s, z_b, t_s, t_b, gamma, beta, num_groups, eps=1e-5):
    B, C, H, W = x.shape
    G = num_groups
    xg = x.reshape(B, G, (C // G) * H * W)
    mean = jnp.mean(xg, axis=-1, keepdims=True)
    var = jnp.mean(jnp.square(xg - mean), axis=-1, keepdims=True)
    xn = ((xg - mean) / jnp.sqrt(var + eps)).reshape(B, C, H, W)
    gn = xn * gamma[None, :, None, None] + beta[None, :, None, None]
    return (z_s[:, :, None, None] * (t_s[:, :, None, None] * gn + t_b[:, :, None, None])
            + z_b[:, :, None, None])


if __name__ == "__main__":
    B, C, H, W = 2, 64, 16, 16     # shapes consistent with AdaGN usage in the UNet
    num_groups = 8

    key = jax.random.PRNGKey(0)
    kx, kzs, kzb, kts, ktb = jax.random.split(key, 5)
    x = jax.random.normal(kx, (B, C, H, W), jnp.float32)
    z_s = jax.random.normal(kzs, (B, C), jnp.float32)
    z_b = jax.random.normal(kzb, (B, C), jnp.float32)
    t_s = jax.random.normal(kts, (B, C), jnp.float32)
    t_b = jax.random.normal(ktb, (B, C), jnp.float32)
    gamma = jnp.ones((C,), jnp.float32)
    beta = jnp.zeros((C,), jnp.float32)

    out = adagn(x, z_s, z_b, t_s, t_b, gamma, beta, num_groups=num_groups)
    out = jax.block_until_ready(out)

    ref = adagn_ref(x, z_s, z_b, t_s, t_b, gamma, beta, num_groups)
    err = float(jnp.max(jnp.abs(out - ref)))

    assert out.shape == (B, C, H, W), out.shape
    assert bool(jnp.all(jnp.isfinite(out)))
    assert err < 1e-3, f"max abs diff vs reference: {err}"
    print("KERNEL_OK")
</pallas_src>

<mosaic_0001>
module attributes {stable_mosaic.version = 11 : i64} {
  func.func @_adagn_kernel(%arg0: i32, %arg1: memref<1x256x64xf32, #tpu.memory_space<vmem>>, %arg2: memref<64x64xf32, #tpu.memory_space<vmem>>, %arg3: memref<1x1x64xf32, #tpu.memory_space<vmem>>, %arg4: memref<1x1x64xf32, #tpu.memory_space<vmem>>, %arg5: memref<1x256x64xf32, #tpu.memory_space<vmem>>) attributes {dimension_semantics = [#tpu.dimension_semantics<parallel>], iteration_bounds = array<i64: 2>, scalar_prefetch = 0 : i64, scratch_operands = 0 : i64, tpu.core_type = #tpu.core_type<tc>, window_params = [{transform_indices = @transform_0, window_bounds = array<i64: 1, 256, 64>}, {pipeline_mode = #tpu.pipeline_mode<synchronous>, transform_indices = @transform_1, window_bounds = array<i64: 64, 64>}, {transform_indices = @transform_2, window_bounds = array<i64: 1, 1, 64>}, {transform_indices = @transform_3, window_bounds = array<i64: 1, 1, 64>}, {transform_indices = @transform_4, window_bounds = array<i64: 1, 256, 64>}]} {
    %c0 = arith.constant 0 : index
    %c0_0 = arith.constant 0 : index
    %c0_1 = arith.constant 0 : index
    %0 = vector.load %arg1[%c0, %c0_0, %c0_1] : memref<1x256x64xf32, #tpu.memory_space<vmem>>, vector<1x256x64xf32>
    %1 = vector.shape_cast %0 : vector<1x256x64xf32> to vector<256x64xf32>
    %cst = arith.constant dense<0.000000e+00> : vector<64xf32>
    %2 = vector.multi_reduction <add>, %1, %cst [0] : vector<256x64xf32> to vector<64xf32>
    %3 = vector.shape_cast %2 : vector<64xf32> to vector<1x64xf32>
    %4 = arith.mulf %1, %1 : vector<256x64xf32>
    %cst_2 = arith.constant dense<0.000000e+00> : vector<64xf32>
    %5 = vector.multi_reduction <add>, %4, %cst_2 [0] : vector<256x64xf32> to vector<64xf32>
    %6 = vector.shape_cast %5 : vector<64xf32> to vector<1x64xf32>
    %c0_3 = arith.constant 0 : index
    %c0_4 = arith.constant 0 : index
    %7 = vector.load %arg2[%c0_3, %c0_4] : memref<64x64xf32, #tpu.memory_space<vmem>>, vector<64x64xf32>
    %cst_5 = arith.constant dense<0.000000e+00> : vector<1x64xf32>
    %8 = tpu.matmul %3, %7, %cst_5 {dimension_numbers = #tpu.dot_dimension_numbers<[1], [0], [0], [1], [0, 0, 1, 1], [], []>} : vector<1x64xf32>, vector<64x64xf32>, vector<1x64xf32> -> vector<1x64xf32>
    %c0_6 = arith.constant 0 : index
    %c0_7 = arith.constant 0 : index
    %9 = vector.load %arg2[%c0_6, %c0_7] : memref<64x64xf32, #tpu.memory_space<vmem>>, vector<64x64xf32>
    %cst_8 = arith.constant dense<0.000000e+00> : vector<1x64xf32>
    %10 = tpu.matmul %6, %9, %cst_8 {dimension_numbers = #tpu.dot_dimension_numbers<[1], [0], [0], [1], [0, 0, 1, 1], [], []>} : vector<1x64xf32>, vector<64x64xf32>, vector<1x64xf32> -> vector<1x64xf32>
    %11 = arith.mulf %8, %8 : vector<1x64xf32>
    %12 = arith.subf %10, %11 : vector<1x64xf32>
    %cst_9 = arith.constant 0.000000e+00 : f32
    %13 = vector.broadcast %cst_9 : f32 to vector<1x64xf32>
    %14 = arith.maximumf %12, %13 : vector<1x64xf32>
    %cst_10 = arith.constant 9.99999974E-6 : f32
    %15 = vector.broadcast %cst_10 : f32 to vector<1x64xf32>
    %16 = arith.addf %14, %15 : vector<1x64xf32>
    %17 = math.rsqrt %16 : vector<1x64xf32>
    %18 = vector.broadcast %8 : vector<1x64xf32> to vector<256x64xf32>
    %19 = arith.subf %1, %18 : vector<256x64xf32>
    %c0_11 = arith.constant 0 : index
    %c0_12 = arith.constant 0 : index
    %c0_13 = arith.constant 0 : index
    %20 = vector.load %arg3[%c0_11, %c0_12, %c0_13] : memref<1x1x64xf32, #tpu.memory_space<vmem>>, vector<1x1x64xf32>
    %21 = vector.shape_cast %20 : vector<1x1x64xf32> to vector<1x64xf32>
    %22 = arith.mulf %17, %21 : vector<1x64xf32>
    %23 = vector.broadcast %22 : vector<1x64xf32> to vector<256x64xf32>
    %24 = arith.mulf %19, %23 : vector<256x64xf32>
    %c0_14 = arith.constant 0 : index
    %c0_15 = arith.constant 0 : index
    %c0_16 = arith.constant 0 : index
    %25 = vector.load %arg4[%c0_14, %c0_15, %c0_16] : memref<1x1x64xf32, #tpu.memory_space<vmem>>, vector<1x1x64xf32>
    %26 = vector.shape_cast %25 : vector<1x1x64xf32> to vector<1x64xf32>
    %27 = vector.broadcast %26 : vector<1x64xf32> to vector<256x64xf32>
    %28 = arith.addf %24, %27 : vector<256x64xf32>
    %c0_17 = arith.constant 0 : index
    %c0_18 = arith.constant 0 : index
    %c0_19 = arith.constant 0 : index
    %29 = vector.load %arg5[%c0_17, %c0_18, %c0_19] : memref<1x256x64xf32, #tpu.memory_space<vmem>>, vector<1x256x64xf32>
    %30 = vector.shape_cast %29 : vector<1x256x64xf32> to vector<256x64xf32>
    %31 = vector.shape_cast %28 : vector<256x64xf32> to vector<1x256x64xf32>
    tpu.vector_store %arg5[%c0_17, %c0_18, %c0_19], %31 {strides = array<i32>} : memref<1x256x64xf32, #tpu.memory_space<vmem>>, vector<1x256x64xf32>,
    return
  }
  func.func @transform_0(%arg0: i32) -> (i32, i32, i32) {
    %c0_i32 = arith.constant 0 : i32
    %c0_i32_0 = arith.constant 0 : i32
    %c0_i32_1 = arith.constant 0 : i32
    return %arg0, %c0_i32, %c0_i32_0 : i32, i32, i32
  }
  func.func @transform_1(%arg0: i32) -> (i32, i32) {
    %c0_i32 = arith.constant 0 : i32
    %c0_i32_0 = arith.constant 0 : i32
    %c0_i32_1 = arith.constant 0 : i32
    return %c0_i32, %c0_i32_0 : i32, i32
  }
  func.func @transform_2(%arg0: i32) -> (i32, i32, i32) {
    %c0_i32 = arith.constant 0 : i32
    %c0_i32_0 = arith.constant 0 : i32
    %c0_i32_1 = arith.constant 0 : i32
    return %arg0, %c0_i32, %c0_i32_0 : i32, i32, i32
  }
  func.func @transform_3(%arg0: i32) -> (i32, i32, i32) {
    %c0_i32 = arith.constant 0 : i32
    %c0_i32_0 = arith.constant 0 : i32
    %c0_i32_1 = arith.constant 0 : i32
    return %arg0, %c0_i32, %c0_i32_0 : i32, i32, i32
  }
  func.func @transform_4(%arg0: i32) -> (i32, i32, i32) {
    %c0_i32 = arith.constant 0 : i32
    %c0_i32_0 = arith.constant 0 : i32
    %c0_i32_1 = arith.constant 0 : i32
    return %arg0, %c0_i32, %c0_i32_0 : i32, i32, i32
  }
}

</mosaic_0001>

<bundles_post_ra>
// kernel: adagn.1
= control target key start
LH: loop header
LB: loop body
LE: loop exit
PB: predicated region body
PF: predicated region fallthrough
CT: control target
= control target key end

     0   :  { %9 = vsyncpa [#allocation3], 0  ;;  %s1751_s0 = inlined_call_operand.hbm [shape: f32[2,256,64], index: 0, kind: input, shape index: {}]   ;;  %s1752_s1 = inlined_call_operand.vmem [shape: f32[64,64], index: 1, kind: input, shape index: {}]   ;;  %s1753_s2 = inlined_call_operand.vmem [shape: f32[2,1,64], index: 2, kind: input, shape index: {}]   ;;  %s1754_s3 = inlined_call_operand.vmem [shape: f32[2,1,64], index: 3, kind: input, shape index: {}]   ;;  %s1755_s4 = inlined_call_operand.hbm [shape: f32[2,256,64], index: 4, kind: output, shape index: {}]  }
   0x1   :  { %11 = vsyncpa [#allocation3 + $0x1], 0 }
   0x2   :  { %12 = vsyncpa [#allocation4], 0 }
   0x3   :  { %14 = vsyncpa [#allocation4 + $0x1], 0  ;;  %s1112_s15 = smov 0   ;;  %s1114_s16 = smov 0  }
   0x4   :  { %s1116_s17 = smov 0   ;;  %s1118_s18 = smov 0  }
   0x5 LB: > { %s1133_s19 = sadd.s32 4294967295, %s1077_s18   ;;  %s856_s20 = sadd.s32 4294967294, %s1077_s18   ;;  %s1077_s18 = sphi %s1118_s18, %s1770_s18   ;;  %s1073_s17 = sphi %s1116_s17, %s1769_s17   ;;  %s1069_s16 = sphi %s1114_s16, %s1768_s16   ;;  %s1065_s15 = sphi %s1112_s15, %s1767_s15  }
   0x6   : > { %s1137_s21 = sadd.s32 1, %s1077_s18   ;;  %s27_s22 = sadd.s32 1, %s1073_s17 }
   0x7   : > { %s24_s23 = ssub.s32 %s1077_s18, %s1137_s21  ;;  %p34_p0 = scmp.ne.s32.totalorder %s1073_s17, %s1069_s16 }
   0x8   : > { %p25_p1 = scmp.eq.s32.totalorder %s24_s23, 0  ;;  %p35_p2 = scmp.eq.s32.totalorder %s1077_s18, 0 }
   0x9   : > { %p40_p3 = scmp.ne.s32.totalorder %s1069_s16, %s1065_s15  ;;  %p41_p4 = scmp.eq.s32.totalorder %s1133_s19, 0 }
   0xa   : > { %s1149_s24 = scalar_select %p25_p1, %s1073_s17, %s27_s22  }
   0xb   : > { %p1151_p5 = por %p35_p2, %p34_p0  ;;  %p1155_p6 = por %p41_p4, %p40_p3 }
   0xc   : > { %p137_p7 = scmp.eq.s32.totalorder %s1133_s19, 1  ;;  %p143_p8 = scmp.eq.s32.totalorder %s856_s20, 1 }
   0xd   : > { %s1759_s26 = scalar_select %p1155_p6, 1, 0 }
   0xe   : > { %p943_p10 = scmp.lt.s32.totalorder %s1077_s18, 2  ;;  %p1162_p11 = por %p137_p7, %p34_p0 }
   0xf   : > { %p1166_p12 = por %p143_p8, %p40_p3  ;;  %s166_s29 = sand.u32 1, %s1073_s17  }
  0x10   : > { %s1760_s27 = scalar_select %p1162_p11, 1, 0 }
  0x11   : > { %s1761_s28 = scalar_select %p1166_p12, 1, 0 }
  0x12   : > { %s873_s30 = sshll.u32 %s1077_s18, 12  ;;  %s859_s5 = sshll.u32 %s166_s29, 8 }
  0x13   : > { %s1175_s8 = scalar_lea.hbm %s1751_s0, %s873_s30  ;;  %s170_s9 = scalar_lea.vmem [#allocation2], %s859_s5 }
  0x14   : > { %s177_s10 = sshll.u32 %s170_s9, 4  ;;  %p1179_p13 = pnand %p943_p10, %p1151_p5  ;;  %s1183_s10 = int_to_ptr.vmem [resolvable:$true] %s177_s10 }
  0x15   : > { %s1185_s12 = scalar_lea.sflag [#allocation3], %s166_s29  ;;  %s985_s13 = scalar_lea.hbm %s1175_s8, 4096 }
  0x16   : > { %p986_p0 = scmp.ne.s32.totalorder %s1175_s8, %s985_s13  ;;  %p987_p1 = pneg %p1179_p13 }
  0x17   : > { %s990_s22 = scalar_lea.hbm %s1751_s0, 8192  ;;  %p991_p4 = scmp.lt.s32.totalorder %s1175_s8, %s1751_s0 }
  0x18   : > { %p988_p2 = pnand %p987_p1, %p986_p0  ;;  %p992_p5 = scmp.lt.s32.totalorder %s990_s22, %s985_s13 }
  0x1a   : > { %p989_p3 = pneg %p988_p2  ;;  %p993_p7 = por %p992_p5, %p991_p4 }
  0x1c   : > { %p994_p8 = pnand %p993_p7, %p989_p3 }
  0x1e   : > { %997 = shalt.err (!%p994_p8)
}
  0x1f   : > { %s998_s29 = scalar_lea.vmem %s1183_s10, 4096  ;;  %s1079_s30 = smov [#allocation2]  }
  0x20   : > { %p999_p10 = scmp.ne.s32.totalorder %s1183_s10, %s998_s29  ;;  %s1003_s5 = sshll.u32 %s1079_s30, 4  ;;  %s1004_s5 = int_to_ptr.vmem [resolvable:$false] %s1003_s5 }
  0x21   : > { %s1005_s6 = scalar_lea.vmem %s1004_s5, 8192  ;;  %p1006_p2 = scmp.lt.s32.totalorder %s1183_s10, %s1004_s5 }
  0x22   : > { %p1001_p9 = pnand %p999_p10, %p987_p1  ;;  %p1007_p12 = scmp.lt.s32.totalorder %s1005_s6, %s998_s29 }
  0x24   : > { %p1002_p0 = pneg %p1001_p9  ;;  %p1008_p11 = por %p1007_p12, %p1006_p2 }
  0x26   : > { %p1009_p6 = pnand %p1008_p11, %p1002_p0 }
  0x28   : > { %1012 = shalt.err (!%p1009_p6)
}
  0x29   : > { %s1080_s7 = smov 128   ;;  %s1081_s9 = smov 8  }
  0x2a   : > { %938 = dma.hbm_to_vmem [thread:$0]  (!%p1179_p13), %s1175_s8, 4096, %s1183_s10, %s1185_s12, %s1080_s7, %s1080_s7, %s1081_s9  }
  0x2b   : > { %p862_p9 = scmp.ge.s32.totalorder %s1077_s18, 1  ;;  %p197_p1 = scmp.lt.s32.totalorder %s1077_s18, 3 }
  0x2d   : > { %p198_p3 = pnand %p862_p9, %p197_p1 }
  0x2e   : > { %s1209_s13 = sand.u32 (!%p198_p3), 1, %s1069_s16   ;;  %p1763_p6 = scmp.ne.s32.totalorder (!%p198_p3), %s1759_s26, 0 }
  0x2f   : > { %201 = sbr.rel (%p198_p3) target bundleno = 396 (0x18c), region = 36  ;;  %s863_s14 = sshll.u32 (!%p198_p3), %s1209_s13, 8 }
  0x30   : > { %s204_s20 = scalar_lea.sflag (!%p198_p3), [#allocation3], %s1209_s13  ;;  %s1215_s22 = scalar_lea.vmem (!%p198_p3), [#allocation2], %s863_s14 }
  0x34   : > { %1056 = dma.done.wait (%p1763_p6), %s204_s20, 4096  }
  0x35   : > { %1058 = vsyncadd (%p1763_p6), %s204_s20, 4294963200  ;;  %v1082_v0 = vmov 0.0   ;;  %vm1083_vm0 = vmmov 0   ;;  %v454_v1 = vld [vmem:[%s1752_s1 + $0x38] sm:$0xff]  ;;  %v453_v2 = vld [vmem:[%s1752_s1 + $0x30] sm:$0xff]  ;;  %vm276_vm1 = vcmask 523264  }
  0x36   : > { %893 = vmatprep.subr.mxu0 %v1082_v0  ;;  %912 = vmatprep.subr.mxu1 %v1082_v0  ;;  %v452_v3 = vld [vmem:[%s1752_s1 + $0x28] sm:$0xff]  ;;  %v1237_v4 = vld [vmem:[%s1215_s22] sm:$0xff]  ;;  %v1243_v6 = vld [vmem:[%s1215_s22 + $0x10] sm:$0xff]  ;;  %p238_p11 = scmp.lt.s32.totalorder %s1133_s19, 1  ;;  %s1615_s30 = scalar_lea.vmem [#allocation5], %s863_s14 }
  0x37   : > { %909 = vmatprep.mubr.msk.f32.mxu0 %vm1083_vm0, %v1082_v0  ;;  %928 = vmatprep.mubr.msk.f32.mxu1 %vm1083_vm0, %v1082_v0  ;;  %v1240_v5 = vld [vmem:[%s1215_s22 + $0x8] sm:$0xff]  ;;  %v1246_v7 = vld [vmem:[%s1215_s22 + $0x18] sm:$0xff]  ;;  %v277_v8 = vsel %vm276_vm1, %v1237_v4, 0.0  ;;  %v451_v9 = vld [vmem:[%s1752_s1 + $0x20] sm:$0xff]  ;;  %v280_v11 = vsel %vm276_vm1, %v1243_v6, 0.0  ;;  %v346_v34 = vmul.f32 %v1237_v4, %v1237_v4  ;;  %v348_v39 = vmul.f32 %v1243_v6, %v1243_v6  ;;  %s874_s14 = sshll.u32 %s1133_s19, 12 }
  0x38   : > { %894 = vmatpush3.msra.mxu0 %v454_v1  ;;  %913 = vmatpush3.msra.mxu1 %v454_v1  ;;  %v278_v10 = vsel %vm276_vm1, %v1240_v5, 0.0  ;;  %v1260_v12 = vld [vmem:[%s1215_s22 + $0x20] sm:$0xff]  ;;  %v450_v14 = vld [vmem:[%s1752_s1 + $0x18] sm:$0xff]  ;;  %v282_v15 = vsel %vm276_vm1, %v1246_v7, 0.0  ;;  %v1270_v16 = vld [vmem:[%s1215_s22 + $0x28] sm:$0xff]  ;;  %v347_v38 = vmul.f32 %v1240_v5, %v1240_v5  ;;  %v349_v43 = vmul.f32 %v1246_v7, %v1246_v7  ;;  %s765_s5 = sshll.u32 %s1615_s30, 4  ;;  %s1678_s7 = scalar_lea.hbm %s1755_s4, %s874_s14  ;;  %s1680_s5 = int_to_ptr.vmem [resolvable:$true] %s765_s5 }
  0x39   : > { %895 = vmatprep.subr.mxu0 %v1082_v0  ;;  %914 = vmatprep.subr.mxu1 %v1082_v0  ;;  %v279_v13 = vadd.f32 %v278_v10, %v277_v8  ;;  %v449_v18 = vld [vmem:[%s1752_s1 + $0x10] sm:$0xff]  ;;  %v284_v19 = vsel %vm276_vm1, %v1260_v12, 0.0  ;;  %v448_v22 = vld [vmem:[%s1752_s1 + $0x8] sm:$0xff]  ;;  %v286_v23 = vsel %vm276_vm1, %v1270_v16, 0.0  ;;  %v1290_v24 = vld [vmem:[%s1215_s22 + $0x38] sm:$0xff]  ;;  %v378_v44 = vsel %vm276_vm1, %v346_v34, 0.0 }
  0x3a   : > { %896 = vmatpush3.msra.mxu0 %v453_v2  ;;  %915 = vmatpush3.msra.mxu1 %v453_v2  ;;  %v1280_v20 = vld [vmem:[%s1215_s22 + $0x30] sm:$0xff]  ;;  %v447_v26 = vld [vmem:[%s1752_s1] sm:$0xff]  ;;  %v290_v30 = vsel %vm276_vm1, %v1290_v24, 0.0  ;;  %v1307_v31 = vld [vmem:[%s1215_s22 + $0x48] sm:$0xff]  ;;  %v350_v48 = vmul.f32 %v1260_v12, %v1260_v12  ;;  %v379_v49 = vsel %vm276_vm1, %v347_v38, 0.0  ;;  %v381_v50 = vsel %vm276_vm1, %v348_v39, 0.0 }
  0x3b   : > { %897 = vmatprep.subr.mxu0 %v1082_v0  ;;  %916 = vmatprep.subr.mxu1 %v1082_v0  ;;  %v281_v17 = vadd.f32 %v280_v11, %v279_v13  ;;  %v288_v27 = vsel %vm276_vm1, %v1280_v20, 0.0  ;;  %v1300_v28 = vld [vmem:[%s1215_s22 + $0x40] sm:$0xff]  ;;  %v1314_v35 = vld [vmem:[%s1215_s22 + $0x50] sm:$0xff]  ;;  %v294_v37 = vsel %vm276_vm1, %v1307_v31, 0.0  ;;  %v1323_v40 = vld [vmem:[%s1215_s22 + $0x58] sm:$0xff]  ;;  %v380_v53 = vadd.f32 %v379_v49, %v378_v44  ;;  %s752_s9 = scalar_lea.sflag [#allocation4], %s1209_s13 }
  0x3c   : > { %898 = vmatpush3.msra.mxu0 %v452_v3  ;;  %917 = vmatpush3.msra.mxu1 %v452_v3  ;;  %v292_v33 = vsel %vm276_vm1, %v1300_v28, 0.0  ;;  %v296_v42 = vsel %vm276_vm1, %v1314_v35, 0.0  ;;  %v1331_v45 = vld [vmem:[%s1215_s22 + $0x60] sm:$0xff]  ;;  %v298_v47 = vsel %vm276_vm1, %v1323_v40, 0.0  ;;  %v1340_v51 = vld [vmem:[%s1215_s22 + $0x68] sm:$0xff]  ;;  %v351_v55 = vmul.f32 %v1270_v16, %v1270_v16  ;;  %v1348_v57 = vld [vmem:[%s1215_s22 + $0x70] sm:$0xff] }
  0x3d   : > { %899 = vmatprep.subr.mxu0 %v1082_v0  ;;  %918 = vmatprep.subr.mxu1 %v1082_v0  ;;  %v283_v21 = vadd.f32 %v282_v15, %v281_v17  ;;  %v300_v54 = vsel %vm276_vm1, %v1331_v45, 0.0  ;;  %v383_v56 = vsel %vm276_vm1, %v349_v43, 0.0  ;;  %v382_v59 = vadd.f32 %v381_v50, %v380_v53  ;;  %v1356_v63 = vld [vmem:[%s1215_s22 + $0x78] sm:$0xff]  ;;  %v1372_v17 = vld [vmem:[%s1215_s22 + $0x88] sm:$0xff]  ;;  %s1013_s20 = scalar_lea.vmem %s1680_s5, 4096  ;;  %p1764_p13 = scmp.ne.s32.totalorder %s1760_s27, 0 }
  0x3e   : > { %900 = vmatpush3.msra.mxu0 %v451_v9  ;;  %919 = vmatpush3.msra.mxu1 %v451_v9  ;;  %v302_v60 = vsel %vm276_vm1, %v1340_v51, 0.0  ;;  %v352_v61 = vmul.f32 %v1280_v20, %v1280_v20  ;;  %v385_v62 = vsel %vm276_vm1, %v350_v48, 0.0  ;;  %v304_v2 = vsel %vm276_vm1, %v1348_v57, 0.0  ;;  %v1364_v9 = vld [vmem:[%s1215_s22 + $0x80] sm:$0xff]  ;;  %v1404_v48 = vld [vmem:[%s1215_s22 + $0xa8] sm:$0xff]  ;;  %p1014_p12 = scmp.ne.s32.totalorder %s1680_s5, %s1013_s20  ;;  %s1084_s8 = smov [#allocation5]  }
  0x3f   : > { %901 = vmatprep.subr.mxu0 %v1082_v0  ;;  %920 = vmatprep.subr.mxu1 %v1082_v0  ;;  %v285_v25 = vadd.f32 %v284_v19, %v283_v21  ;;  %v384_v1 = vadd.f32 %v383_v56, %v382_v59  ;;  %v353_v3 = vmul.f32 %v1290_v24, %v1290_v24  ;;  %v387_v8 = vsel %vm276_vm1, %v351_v55, 0.0  ;;  %v1412_v55 = vld [vmem:[%s1215_s22 + $0xb0] sm:$0xff]  ;;  %s1017_s10 = sshll.u32 %s1084_s8, 4  ;;  %s1018_s10 = int_to_ptr.vmem [resolvable:$false] %s1017_s10 }
  0x40   : > { %902 = vmatpush3.msra.mxu0 %v450_v14  ;;  %921 = vmatpush3.msra.mxu1 %v450_v14  ;;  %v306_v13 = vsel %vm276_vm1, %v1356_v63, 0.0  ;;  %v354_v14 = vmul.f32 %v1300_v28, %v1300_v28  ;;  %v389_v15 = vsel %vm276_vm1, %v352_v61, 0.0  ;;  %v308_v21 = vsel %vm276_vm1, %v1364_v9, 0.0  ;;  %p1015_p4 = pnand %p1014_p12, %p1764_p13  ;;  %p1020_p7 = scmp.lt.s32.totalorder %s1680_s5, %s1018_s10 }
  0x41   : > { %903 = vmatprep.subr.mxu0 %v1082_v0  ;;  %922 = vmatprep.subr.mxu1 %v1082_v0  ;;  %v287_v29 = vadd.f32 %v286_v23, %v285_v25  ;;  %v386_v11 = vadd.f32 %v385_v62, %v384_v1  ;;  %v391_v23 = vsel %vm276_vm1, %v353_v3, 0.0  ;;  %v1380_v25 = vld [vmem:[%s1215_s22 + $0x90] sm:$0xff]  ;;  %v357_v38 = vmul.f32 %v1323_v40, %v1323_v40  ;;  %v1420_v62 = vld [vmem:[%s1215_s22 + $0xb8] sm:$0xff] }
  0x42   : > { %904 = vmatpush3.msra.mxu0 %v449_v18  ;;  %923 = vmatpush3.msra.mxu1 %v449_v18  ;;  %v359_v53 = vmul.f32 %v1340_v51, %v1340_v51  ;;  %v318_v59 = vsel %vm276_vm1, %v1404_v48, 0.0  ;;  %v361_v3 = vmul.f32 %v1356_v63, %v1356_v63  ;;  %p1016_p5 = pneg %p1015_p4 }
  0x43   : > { %905 = vmatprep.subr.mxu0 %v1082_v0  ;;  %924 = vmatprep.subr.mxu1 %v1082_v0  ;;  %v289_v32 = vadd.f32 %v288_v27, %v287_v29  ;;  %v388_v19 = vadd.f32 %v387_v8, %v386_v11  ;;  %v310_v29 = vsel %vm276_vm1, %v1372_v17, 0.0 }
  0x44   : > { %906 = vmatpush3.msra.mxu0 %v448_v22  ;;  %925 = vmatpush3.msra.mxu1 %v448_v22  ;;  %v355_v22 = vmul.f32 %v1307_v31, %v1307_v31  ;;  %v403_v8 = vsel %vm276_vm1, %v359_v53, 0.0 }
  0x45   : > { %907 = vmatprep.subr.mxu0 %v1082_v0  ;;  %926 = vmatprep.subr.mxu1 %v1082_v0  ;;  %v291_v36 = vadd.f32 %v290_v30, %v289_v32  ;;  %v390_v27 = vadd.f32 %v389_v15, %v388_v19  ;;  %v356_v30 = vmul.f32 %v1314_v35, %v1314_v35  ;;  %v393_v32 = vsel %vm276_vm1, %v354_v14, 0.0  ;;  %v1436_v19 = vld [vmem:[%s1215_s22 + $0xc8] sm:$0xff] }
  0x46   : > { %908 = vmatpush3.msra.mxu0 %v447_v26  ;;  %927 = vmatpush3.msra.mxu1 %v447_v26  ;;  %v395_v39 = vsel %vm276_vm1, %v355_v22, 0.0  ;;  %v322_v14 = vsel %vm276_vm1, %v1420_v62, 0.0  ;;  %v362_v15 = vmul.f32 %v1364_v9, %v1364_v9 }
  0x47   : > { %v293_v41 = vadd.f32 %v292_v33, %v291_v36  ;;  %v1388_v33 = vld [vmem:[%s1215_s22 + $0x98] sm:$0xff]  ;;  %v392_v36 = vadd.f32 %v391_v23, %v390_v27  ;;  %v407_v27 = vsel %vm276_vm1, %v361_v3, 0.0 }
  0x48   : > { %v314_v44 = vsel %vm276_vm1, %v1388_v33, 0.0 }
  0x49   : > { %v295_v46 = vadd.f32 %v294_v37, %v293_v41  ;;  %v312_v37 = vsel %vm276_vm1, %v1380_v25, 0.0  ;;  %v1396_v41 = vld [vmem:[%s1215_s22 + $0xa0] sm:$0xff]  ;;  %v394_v43 = vadd.f32 %v393_v32, %v392_v36  ;;  %v364_v36 = vmul.f32 %v1380_v25, %v1380_v25 }
  0x4a   : > { %v366_v53 = vmul.f32 %v1396_v41, %v1396_v41 }
  0x4b   : > { %v297_v52 = vadd.f32 %v296_v42, %v295_v46  ;;  %v358_v46 = vmul.f32 %v1331_v45, %v1331_v45  ;;  %v396_v50 = vadd.f32 %v395_v39, %v394_v43 }
  0x4d   : > { %v299_v58 = vadd.f32 %v298_v47, %v297_v52  ;;  %v397_v47 = vsel %vm276_vm1, %v356_v30, 0.0  ;;  %v316_v52 = vsel %vm276_vm1, %v1396_v41, 0.0  ;;  %v401_v61 = vsel %vm276_vm1, %v358_v46, 0.0 }
  0x4f   : > { %v301_v0 = vadd.f32 %v300_v54, %v299_v58  ;;  %v399_v54 = vsel %vm276_vm1, %v357_v38, 0.0  ;;  %v398_v58 = vadd.f32 %v397_v47, %v396_v50  ;;  %v1452_v38 = vld [vmem:[%s1215_s22 + $0xd8] sm:$0xff]  ;;  %v1460_v47 = vld [vmem:[%s1215_s22 + $0xe0] sm:$0xff] }
  0x51   : > { %v303_v10 = vadd.f32 %v302_v60, %v301_v0  ;;  %v360_v60 = vmul.f32 %v1348_v57, %v1348_v57  ;;  %v400_v1 = vadd.f32 %v399_v54, %v398_v58  ;;  %v413_v54 = vsel %vm276_vm1, %v364_v36, 0.0 }
  0x53   : > { %v305_v18 = vadd.f32 %v304_v2, %v303_v10  ;;  %v320_v2 = vsel %vm276_vm1, %v1412_v55, 0.0  ;;  %v1428_v10 = vld [vmem:[%s1215_s22 + $0xc0] sm:$0xff] }
  0x54   : > { %v324_v23 = vsel %vm276_vm1, %v1428_v10, 0.0 }
  0x55   : > { %v307_v26 = vadd.f32 %v306_v13, %v305_v18  ;;  %v402_v13 = vadd.f32 %v401_v61, %v400_v1  ;;  %v405_v18 = vsel %vm276_vm1, %v360_v60, 0.0  ;;  %v332_v60 = vsel %vm276_vm1, %v1460_v47, 0.0  ;;  %v1476_v1 = vld [vmem:[%s1215_s22 + $0xf0] sm:$0xff] }
  0x56   : > { %v367_v61 = vmul.f32 %v1404_v48, %v1404_v48 }
  0x57   : > { %v309_v34 = vadd.f32 %v308_v21, %v307_v26  ;;  %v404_v22 = vadd.f32 %v403_v8, %v402_v13  ;;  %v363_v26 = vmul.f32 %v1372_v17, %v1372_v17  ;;  %v417_v13 = vsel %vm276_vm1, %v366_v53, 0.0 }
  0x58   : > { %v373_v53 = vmul.f32 %v1452_v38, %v1452_v38 }
  0x59   : > { %v311_v42 = vadd.f32 %v310_v29, %v309_v34  ;;  %v1444_v29 = vld [vmem:[%s1215_s22 + $0xd0] sm:$0xff]  ;;  %v406_v32 = vadd.f32 %v405_v18, %v404_v22  ;;  %v326_v34 = vsel %vm276_vm1, %v1436_v19, 0.0  ;;  %v411_v46 = vsel %vm276_vm1, %v363_v26, 0.0 }
  0x5a   : > { %v328_v43 = vsel %vm276_vm1, %v1444_v29, 0.0  ;;  %v369_v22 = vmul.f32 %v1420_v62, %v1420_v62 }
  0x5b   : > { %v313_v49 = vadd.f32 %v312_v37, %v311_v42  ;;  %v409_v37 = vsel %vm276_vm1, %v362_v15, 0.0  ;;  %v408_v42 = vadd.f32 %v407_v27, %v406_v32  ;;  %v370_v32 = vmul.f32 %v1428_v10, %v1428_v10 }
  0x5d   : > { %v315_v56 = vadd.f32 %v314_v44, %v313_v49  ;;  %v365_v44 = vmul.f32 %v1388_v33, %v1388_v33  ;;  %v410_v50 = vadd.f32 %v409_v37, %v408_v42  ;;  %v423_v42 = vsel %vm276_vm1, %v369_v22, 0.0 }
  0x5f   : > { %v317_v0 = vadd.f32 %v316_v52, %v315_v56  ;;  %v330_v52 = vsel %vm276_vm1, %v1452_v38, 0.0  ;;  %v1468_v56 = vld [vmem:[%s1215_s22 + $0xe8] sm:$0xff] }
  0x60   : > { %v334_v8 = vsel %vm276_vm1, %v1468_v56, 0.0 }
  0x61   : > { %v319_v11 = vadd.f32 %v318_v59, %v317_v0  ;;  %v412_v59 = vadd.f32 %v411_v46, %v410_v50  ;;  %v415_v0 = vsel %vm276_vm1, %v365_v44, 0.0  ;;  %v372_v46 = vmul.f32 %v1444_v29, %v1444_v29 }
  0x63   : > { %v321_v21 = vadd.f32 %v320_v2, %v319_v11  ;;  %v414_v3 = vadd.f32 %v413_v54, %v412_v59  ;;  %v368_v11 = vmul.f32 %v1412_v55, %v1412_v55 }
  0x65   : > { %v323_v30 = vadd.f32 %v322_v14, %v321_v21  ;;  %v1484_v14 = vld [vmem:[%s1215_s22 + $0xf8] sm:$0xff]  ;;  %v416_v18 = vadd.f32 %v415_v0, %v414_v3  ;;  %v336_v21 = vsel %vm276_vm1, %v1476_v1, 0.0  ;;  %v375_v3 = vmul.f32 %v1468_v56, %v1468_v56  ;;  %s1523_s22 = scalar_select %p238_p11, %s1133_s19, 1 }
  0x67   : > { %v325_v39 = vadd.f32 %v324_v23, %v323_v30  ;;  %v419_v23 = vsel %vm276_vm1, %v367_v61, 0.0  ;;  %v418_v27 = vadd.f32 %v417_v13, %v416_v18  ;;  %v338_v30 = vsel %vm276_vm1, %v1484_v14, 0.0  ;;  %s240_s12 = scalar_lea.vmem %s1753_s2, %s1523_s22  ;;  %s243_s29 = scalar_lea.vmem %s1754_s3, %s1523_s22 }
  0x68   : > { %v429_v61 = vsel %vm276_vm1, %v372_v46, 0.0  ;;  %s1019_s22 = scalar_lea.vmem %s1018_s10, 8192 }
  0x69   : > { %v327_v49 = vadd.f32 %v326_v34, %v325_v39  ;;  %v421_v34 = vsel %vm276_vm1, %v368_v11, 0.0  ;;  %v420_v37 = vadd.f32 %v419_v23, %v418_v27  ;;  %v371_v39 = vmul.f32 %v1436_v19, %v1436_v19  ;;  %p1021_p8 = scmp.lt.s32.totalorder %s1019_s22, %s1013_s20 }
  0x6a   : > { %v377_v23 = vmul.f32 %v1484_v14, %v1484_v14 }
  0x6b   : > { %v329_v58 = vadd.f32 %v328_v43, %v327_v49  ;;  %v422_v44 = vadd.f32 %v421_v34, %v420_v37  ;;  %v425_v49 = vsel %vm276_vm1, %v370_v32, 0.0  ;;  %v427_v54 = vsel %vm276_vm1, %v371_v39, 0.0  ;;  %p1022_p10 = por %p1021_p8, %p1020_p7 }
  0x6d   : > { %v331_v2 = vadd.f32 %v330_v52, %v329_v58  ;;  %v424_v52 = vadd.f32 %v423_v42, %v422_v44  ;;  %p1023_p0 = pnand %p1022_p10, %p1016_p5 }
  0x6f   : > { %v333_v15 = vadd.f32 %v332_v60, %v331_v2  ;;  %v426_v59 = vadd.f32 %v425_v49, %v424_v52  ;;  %v374_v60 = vmul.f32 %v1460_v47, %v1460_v47 }
  0x71   : > { %v335_v26 = vadd.f32 %v334_v8, %v333_v15  ;;  %v428_v2 = vadd.f32 %v427_v54, %v426_v59  ;;  %v431_v8 = vsel %vm276_vm1, %v373_v53, 0.0  ;;  %v376_v15 = vmul.f32 %v1476_v1, %v1476_v1 }
  0x72   : > { %v433_v18 = vsel %vm276_vm1, %v374_v60, 0.0 }
  0x73   : > { %v337_v36 = vadd.f32 %v336_v21, %v335_v26  ;;  %v430_v13 = vadd.f32 %v429_v61, %v428_v2  ;;  %v435_v26 = vsel %vm276_vm1, %v375_v3, 0.0  ;;  %v437_v32 = vsel %vm276_vm1, %v376_v15, 0.0 }
  0x75   : > { %v339_v43 = vadd.f32 %v338_v30, %v337_v36  ;;  %v432_v22 = vadd.f32 %v431_v8, %v430_v13  ;;  %v439_v36 = vsel %vm276_vm1, %v377_v23, 0.0 }
  0x77   : > { %v340_v50 = vrot.slane %v339_v43, 4  ;;  %v434_v30 = vadd.f32 %v433_v18, %v432_v22 }
  0x79   : > { %v341_v58 = vadd.f32 %v340_v50, %v339_v43  ;;  %v436_v34 = vadd.f32 %v435_v26, %v434_v30 }
  0x7b   : > { %v342_v0 = vrot.slane %v341_v58, 2  ;;  %v438_v37 = vadd.f32 %v437_v32, %v436_v34 }
  0x7d   : > { %v343_v11 = vadd.f32 %v342_v0, %v341_v58  ;;  %v440_v39 = vadd.f32 %v439_v36, %v438_v37  ;;  %v606_v58 = vlaneseq }
  0x7f   : > { %v344_v21 = vrot.slane %v343_v11, 1  ;;  %v441_v42 = vrot.slane %v440_v39, 4  ;;  %v607_v2 = vshrl.u32 %v606_v58, 7 }
  0x81   : > { %v345_v27 = vadd.f32 %v344_v21, %v343_v11  ;;  %v442_v43 = vadd.f32 %v441_v42, %v440_v39  ;;  %v608_v8 = vsub.s32 0, %v607_v2 }
  0x83   : > { %910 = vmatmul.mubr.msk.f32.vlgmr.msra.gmra.mxu0 %vm276_vm1, %v345_v27  ;;  %v443_v44 = vrot.slane %v442_v43, 2  ;;  %v642_v27 = vld [vmem:[%s240_s12] sm:$0x1] }
  0x85   : > { %v444_v46 = vadd.f32 %v443_v44, %v442_v43 }
  0x87   : > { %v445_v49 = vrot.slane %v444_v46, 1 }
  0x89   : > { %v446_v50 = vadd.f32 %v445_v49, %v444_v46 }
  0x8b   : > { %929 = vmatmul.mubr.msk.f32.vlgmr.msra.gmra.mxu1 %vm276_vm1, %v446_v50 }
 0x143   : > { %v524_v52 = vpop.f32.mrf.mxu0 }
 0x144   : > { %v601_v54 = vmul.f32 %v524_v52, %v524_v52  ;;  %v1525_v11 = vrot.slane %v524_v52, %v608_v8 }
 0x145   : > { %v911_v53 = vpop.f32.mrf.mxu0 }
 0x146   : > { %v610_v13 = vsub.f32 %v1237_v4, %v1525_v11  ;;  %v611_v15 = vsub.f32 %v1240_v5, %v1525_v11  ;;  %v612_v18 = vsub.f32 %v1243_v6, %v1525_v11  ;;  %v613_v21 = vsub.f32 %v1246_v7, %v1525_v11 }
 0x147   : > { %v614_v22 = vsub.f32 %v1260_v12, %v1525_v11  ;;  %v615_v23 = vsub.f32 %v1270_v16, %v1525_v11  ;;  %v616_v26 = vsub.f32 %v1280_v20, %v1525_v11  ;;  %v617_v4 = vsub.f32 %v1290_v24, %v1525_v11 }
 0x148   : > { %v618_v5 = vsub.f32 %v1300_v28, %v1525_v11  ;;  %v619_v6 = vsub.f32 %v1307_v31, %v1525_v11  ;;  %v620_v7 = vsub.f32 %v1314_v35, %v1525_v11  ;;  %v621_v12 = vsub.f32 %v1323_v40, %v1525_v11 }
 0x149   : > { %v622_v16 = vsub.f32 %v1331_v45, %v1525_v11  ;;  %v623_v20 = vsub.f32 %v1340_v51, %v1525_v11  ;;  %v624_v28 = vsub.f32 %v1348_v57, %v1525_v11  ;;  %v625_v31 = vsub.f32 %v1356_v63, %v1525_v11 }
 0x14a   : > { %v626_v30 = vsub.f32 %v1364_v9, %v1525_v11  ;;  %v627_v35 = vsub.f32 %v1372_v17, %v1525_v11  ;;  %v628_v40 = vsub.f32 %v1380_v25, %v1525_v11  ;;  %v629_v45 = vsub.f32 %v1388_v33, %v1525_v11 }
 0x14b   : > { %v597_v59 = vpop.f32.mrf.mxu1  ;;  %v630_v51 = vsub.f32 %v1396_v41, %v1525_v11  ;;  %v631_v57 = vsub.f32 %v1404_v48, %v1525_v11  ;;  %v632_v63 = vsub.f32 %v1412_v55, %v1525_v11  ;;  %v633_v9 = vsub.f32 %v1420_v62, %v1525_v11 }
 0x14c   : > { %v602_v60 = vsub.f32 %v597_v59, %v601_v54  ;;  %v634_v17 = vsub.f32 %v1428_v10, %v1525_v11  ;;  %v635_v25 = vsub.f32 %v1436_v19, %v1525_v11  ;;  %v636_v33 = vsub.f32 %v1444_v29, %v1525_v11  ;;  %v1599_v59 = vld [vmem:[%s243_s29] ss:$0 sm:$0xff] }
 0x14d   : > { %v930_v61 = vpop.f32.mrf.mxu1  ;;  %v637_v41 = vsub.f32 %v1452_v38, %v1525_v11  ;;  %v638_v55 = vsub.f32 %v1460_v47, %v1525_v11  ;;  %v639_v62 = vsub.f32 %v1468_v56, %v1525_v11  ;;  %v640_v10 = vsub.f32 %v1476_v1, %v1525_v11 }
 0x14e   : > { %v603_v0 = vmax.f32 %v602_v60, 0.0  ;;  %v641_v19 = vsub.f32 %v1484_v14, %v1525_v11 }
 0x150   : > { %v604_v3 = vadd.f32 1e-05, %v603_v0 }
 0x152   : > { %983 = vrsqrt.f32 %v604_v3 }
 0x15f   : > { %v984_v24 = vpop.eup %983 }
 0x160   : > { %v643_v32 = vmul.f32 %v984_v24, %v642_v27 }
 0x162   : > { %v647_v48 = vrot.slane %v643_v32, %v608_v8 }
 0x164   : > { %v648_v34 = vmul.f32 %v647_v48, %v610_v13  ;;  %v649_v36 = vmul.f32 %v647_v48, %v611_v15  ;;  %v650_v37 = vmul.f32 %v647_v48, %v612_v18  ;;  %v651_v29 = vmul.f32 %v647_v48, %v613_v21 }
 0x165   : > { %v652_v39 = vmul.f32 %v647_v48, %v614_v22  ;;  %v653_v42 = vmul.f32 %v647_v48, %v615_v23  ;;  %v654_v38 = vmul.f32 %v647_v48, %v616_v26  ;;  %v655_v43 = vmul.f32 %v647_v48, %v617_v4 }
 0x166   : > { %v656_v47 = vmul.f32 %v647_v48, %v618_v5  ;;  %v657_v56 = vmul.f32 %v647_v48, %v619_v6  ;;  %v658_v44 = vmul.f32 %v647_v48, %v620_v7  ;;  %v659_v46 = vmul.f32 %v647_v48, %v621_v12 }
 0x167   : > { %v660_v1 = vmul.f32 %v647_v48, %v622_v16  ;;  %v661_v49 = vmul.f32 %v647_v48, %v623_v20  ;;  %v662_v50 = vmul.f32 %v647_v48, %v624_v28  ;;  %v663_v14 = vmul.f32 %v647_v48, %v625_v31 }
 0x168   : > { %v664_v52 = vmul.f32 %v647_v48, %v626_v30  ;;  %v665_v53 = vmul.f32 %v647_v48, %v627_v35  ;;  %v666_v54 = vmul.f32 %v647_v48, %v628_v40  ;;  %v667_v58 = vmul.f32 %v647_v48, %v629_v45 }
 0x169   : > { %v668_v60 = vmul.f32 %v647_v48, %v630_v51  ;;  %v669_v61 = vmul.f32 %v647_v48, %v631_v57  ;;  %v670_v0 = vmul.f32 %v647_v48, %v632_v63  ;;  %v671_v2 = vmul.f32 %v647_v48, %v633_v9 }
 0x16a   : > { %v672_v3 = vmul.f32 %v647_v48, %v634_v17  ;;  %v673_v8 = vmul.f32 %v647_v48, %v635_v25  ;;  %v674_v11 = vmul.f32 %v647_v48, %v636_v33  ;;  %v675_v13 = vmul.f32 %v647_v48, %v637_v41 }
 0x16b   : > { %v676_v15 = vmul.f32 %v647_v48, %v638_v55  ;;  %v677_v18 = vmul.f32 %v647_v48, %v639_v62  ;;  %v678_v21 = vmul.f32 %v647_v48, %v640_v10  ;;  %v679_v22 = vmul.f32 %v647_v48, %v641_v19 }
 0x16c   : > { %v687_v23 = vadd.f32 %v1599_v59, %v648_v34  ;;  %v688_v26 = vadd.f32 %v1599_v59, %v649_v36  ;;  %v689_v4 = vadd.f32 %v1599_v59, %v650_v37  ;;  %v690_v5 = vadd.f32 %v1599_v59, %v651_v29 }
 0x16d   : > { %v691_v6 = vadd.f32 %v1599_v59, %v652_v39  ;;  %v692_v27 = vadd.f32 %v1599_v59, %v653_v42  ;;  %v693_v7 = vadd.f32 %v1599_v59, %v654_v38  ;;  %v694_v12 = vadd.f32 %v1599_v59, %v655_v43 }
 0x16e   : > { %v695_v16 = vadd.f32 %v1599_v59, %v656_v47  ;;  %v696_v20 = vadd.f32 %v1599_v59, %v657_v56  ;;  %v697_v24 = vadd.f32 %v1599_v59, %v658_v44  ;;  %v698_v28 = vadd.f32 %v1599_v59, %v659_v46  ;;  %719 = vst.msk [vmem:[%s1615_s30] sm:$0xff] %vm276_vm1, %v687_v23 }
 0x16f   : > { %720 = vst.msk [vmem:[%s1615_s30 + $0x8] sm:$0xff] %vm276_vm1, %v688_v26  ;;  %721 = vst.msk [vmem:[%s1615_s30 + $0x10] sm:$0xff] %vm276_vm1, %v689_v4  ;;  %v699_v31 = vadd.f32 %v1599_v59, %v660_v1  ;;  %v700_v30 = vadd.f32 %v1599_v59, %v661_v49  ;;  %v701_v35 = vadd.f32 %v1599_v59, %v662_v50 }
 0x170   : > { %722 = vst.msk [vmem:[%s1615_s30 + $0x18] sm:$0xff] %vm276_vm1, %v690_v5  ;;  %v702_v40 = vadd.f32 %v1599_v59, %v663_v14  ;;  %723 = vst.msk [vmem:[%s1615_s30 + $0x20] sm:$0xff] %vm276_vm1, %v691_v6  ;;  %v703_v45 = vadd.f32 %v1599_v59, %v664_v52  ;;  %v704_v51 = vadd.f32 %v1599_v59, %v665_v53 }
 0x171   : > { %724 = vst.msk [vmem:[%s1615_s30 + $0x28] sm:$0xff] %vm276_vm1, %v692_v27  ;;  %725 = vst.msk [vmem:[%s1615_s30 + $0x30] sm:$0xff] %vm276_vm1, %v693_v7  ;;  %v705_v32 = vadd.f32 %v1599_v59, %v666_v54  ;;  %v706_v57 = vadd.f32 %v1599_v59, %v667_v58  ;;  %v707_v63 = vadd.f32 %v1599_v59, %v668_v60 }
 0x172   : > { %726 = vst.msk [vmem:[%s1615_s30 + $0x38] sm:$0xff] %vm276_vm1, %v694_v12  ;;  %727 = vst.msk [vmem:[%s1615_s30 + $0x40] sm:$0xff] %vm276_vm1, %v695_v16  ;;  %v708_v9 = vadd.f32 %v1599_v59, %v669_v61  ;;  %v709_v17 = vadd.f32 %v1599_v59, %v670_v0  ;;  %v710_v25 = vadd.f32 %v1599_v59, %v671_v2 }
 0x173   : > { %728 = vst.msk [vmem:[%s1615_s30 + $0x48] sm:$0xff] %vm276_vm1, %v696_v20  ;;  %729 = vst.msk [vmem:[%s1615_s30 + $0x50] sm:$0xff] %vm276_vm1, %v697_v24  ;;  %v711_v33 = vadd.f32 %v1599_v59, %v672_v3  ;;  %v712_v41 = vadd.f32 %v1599_v59, %v673_v8  ;;  %v713_v48 = vadd.f32 %v1599_v59, %v674_v11 }
 0x174   : > { %730 = vst.msk [vmem:[%s1615_s30 + $0x58] sm:$0xff] %vm276_vm1, %v698_v28  ;;  %731 = vst.msk [vmem:[%s1615_s30 + $0x60] sm:$0xff] %vm276_vm1, %v699_v31  ;;  %v714_v55 = vadd.f32 %v1599_v59, %v675_v13  ;;  %v715_v62 = vadd.f32 %v1599_v59, %v676_v15  ;;  %v716_v10 = vadd.f32 %v1599_v59, %v677_v18 }
 0x175   : > { %732 = vst.msk [vmem:[%s1615_s30 + $0x68] sm:$0xff] %vm276_vm1, %v700_v30  ;;  %733 = vst.msk [vmem:[%s1615_s30 + $0x70] sm:$0xff] %vm276_vm1, %v701_v35  ;;  %v717_v19 = vadd.f32 %v1599_v59, %v678_v21  ;;  %v718_v34 = vadd.f32 %v1599_v59, %v679_v22 }
 0x176   : > { %734 = vst.msk [vmem:[%s1615_s30 + $0x78] sm:$0xff] %vm276_vm1, %v702_v40  ;;  %735 = vst.msk [vmem:[%s1615_s30 + $0x80] sm:$0xff] %vm276_vm1, %v703_v45 }
 0x177   : > { %736 = vst.msk [vmem:[%s1615_s30 + $0x88] sm:$0xff] %vm276_vm1, %v704_v51  ;;  %737 = vst.msk [vmem:[%s1615_s30 + $0x90] sm:$0xff] %vm276_vm1, %v705_v32 }
 0x178   : > { %738 = vst.msk [vmem:[%s1615_s30 + $0x98] sm:$0xff] %vm276_vm1, %v706_v57  ;;  %739 = vst.msk [vmem:[%s1615_s30 + $0xa0] sm:$0xff] %vm276_vm1, %v707_v63 }
 0x179   : > { %740 = vst.msk [vmem:[%s1615_s30 + $0xa8] sm:$0xff] %vm276_vm1, %v708_v9  ;;  %741 = vst.msk [vmem:[%s1615_s30 + $0xb0] sm:$0xff] %vm276_vm1, %v709_v17 }
 0x17a   : > { %742 = vst.msk [vmem:[%s1615_s30 + $0xb8] sm:$0xff] %vm276_vm1, %v710_v25  ;;  %743 = vst.msk [vmem:[%s1615_s30 + $0xc0] sm:$0xff] %vm276_vm1, %v711_v33 }
 0x17b   : > { %744 = vst.msk [vmem:[%s1615_s30 + $0xc8] sm:$0xff] %vm276_vm1, %v712_v41  ;;  %745 = vst.msk [vmem:[%s1615_s30 + $0xd0] sm:$0xff] %vm276_vm1, %v713_v48 }
 0x17c   : > { %746 = vst.msk [vmem:[%s1615_s30 + $0xd8] sm:$0xff] %vm276_vm1, %v714_v55  ;;  %747 = vst.msk [vmem:[%s1615_s30 + $0xe0] sm:$0xff] %vm276_vm1, %v715_v62 }
 0x17d   : > { %748 = vst.msk [vmem:[%s1615_s30 + $0xe8] sm:$0xff] %vm276_vm1, %v716_v10  ;;  %749 = vst.msk [vmem:[%s1615_s30 + $0xf0] sm:$0xff] %vm276_vm1, %v717_v19 }
 0x17e   : > { %750 = vst.msk [vmem:[%s1615_s30 + $0xf8] sm:$0xff] %vm276_vm1, %v718_v34 }
 0x17f   : > { %1026 = shalt.err (!%p1023_p0)
}
 0x180   : > { %s1027_s26 = scalar_lea.hbm %s1678_s7, 4096  ;;  %s1031_s23 = scalar_lea.hbm %s1755_s4, 8192 }
 0x181   : > { %p1028_p2 = scmp.ne.s32.totalorder %s1678_s7, %s1027_s26  ;;  %p1032_p3 = scmp.lt.s32.totalorder %s1678_s7, %s1755_s4 }
 0x182   : > { %p1033_p6 = scmp.lt.s32.totalorder %s1031_s23, %s1027_s26 }
 0x183   : > { %p1029_p9 = pnand %p1028_p2, %p1764_p13 }
 0x184   : > { %p1034_p11 = por %p1033_p6, %p1032_p3 }
 0x185   : > { %p1030_p1 = pneg %p1029_p9 }
 0x187   : > { %p1035_p12 = pnand %p1034_p11, %p1030_p1 }
 0x189   : > { %1038 = shalt.err (!%p1035_p12)
}
 0x18a   : > { %s1085_s30 = smov 128   ;;  %s1086_s14 = smov 8  }
 0x18b   : > { %933 = dma.vmem_to_hbm [thread:$0]  (%p1764_p13), %s1680_s5, 4096, %s1678_s7, %s752_s9, %s1085_s30, %s1085_s30, %s1086_s14  }
 0x18c PF: > { %s780_s19 = sand.u32 1, %s1065_s15   ;;  %p1765_p4 = scmp.ne.s32.totalorder %s1761_s28, 0 }
 0x18d   : > { %p1766_p5 = scmp.ge.s32.totalorder %s1077_s18, 2  ;;  %s781_s6 = scalar_lea.sflag [#allocation4], %s780_s19 }
 0x18f   : > { %p940_p7 = pnand %p1766_p5, %p1765_p4 }
 0x191   : > { %p941_p8 = pneg %p940_p7 }
 0x193   : > { %1060 = dma.done.wait (%p941_p8), %s781_s6, 4096  }
 0x194   : > { %1062 = vsyncadd (%p941_p8), %s781_s6, 4294963200  ;;  %p17_p10 = scmp.ge.s32.totalorder %s1137_s21, 4   ;;  %s1767_s15 = smov %s1069_s16 }
 0x195   : > { %s1768_s16 = smov %s1073_s17  ;;  %s1769_s17 = smov %s1149_s24 }
 0x196   : > { %s1770_s18 = smov %s1137_s21  ;;  %19 = sbr.rel (!%p17_p10) target bundleno = 5 (0x5), region = 87 }
 0x19b   :  { %786 = vsyncpa [#allocation3], 1 }
 0x19c   :  { %788 = vsyncpa [#allocation3 + $0x1], 1 }
 0x19d   :  { %789 = vsyncpa [#allocation4], 1 }
 0x19e   :  { %791 = vsyncpa [#allocation4 + $0x1], 1 }

</bundles_post_ra>
